<compile_context>
chip_gen: v7x
topology: tpu7x:2x2x1
jax: 0.10.0
libtpu: 0.0.40
codegen_flags: <defaults>
</compile_context>

<pallas_src>
import functools

import jax
import jax.numpy as jnp
from jax.experimental import pallas as pl
from jax.experimental.pallas import tpu as pltpu


def _round_up(x, m):
    return ((x + m - 1) // m) * m


def _vq_kernel(x_ref, embed_ref, embed_t_ref, half_esq_ref,
               q_ref, idx_ref, sse_ref, *, n_valid, block_rows):
    """One row-tile of the flattened input per grid step.

    x_ref:        (TM, D)     VMEM  input rows
    embed_ref:    (D, E)      VMEM  codebook (resident across steps)
    embed_t_ref:  (E, D)      VMEM  codebook transpose (resident)
    half_esq_ref: (1, E)      VMEM  0.5 * per-code squared norms (resident)
    q_ref:        (TM, D)     VMEM  quantized rows (lane-dense on D)
    idx_ref:      (TM, 1)     VMEM  nearest-code indices
    sse_ref:      (1, 1, 1)   VMEM  this tile's partial squared error
    """
    i = pl.program_id(0)
    x = x_ref[...]                                                  # (TM, D)

    # argmax of -dist == argmax of (x.e - 0.5*||e||^2); ||x||^2 is row-constant.
    # TODO(synk): on v6e/v7x the operands could be cast to bf16 (f32 accumulation)
    # to double MXU throughput; kept f32 here to match the reference bit-for-bit.
    scores = jnp.dot(x, embed_ref[...],
                     preferred_element_type=jnp.float32) - half_esq_ref[...]

    e = scores.shape[-1]
    col = jax.lax.broadcasted_iota(jnp.int32, scores.shape, 1)      # (TM, E)
    row_max = jnp.max(scores, axis=-1, keepdims=True)               # (TM, 1)
    # first index attaining the max (matches torch.max tie behaviour)
    idx = jnp.min(jnp.where(scores == row_max, col, e),
                  axis=-1, keepdims=True)                           # (TM, 1) int32

    # codebook gather as a one-hot matmul on the MXU (exact for 0/1 weights)
    onehot = (col == idx).astype(jnp.float32)                       # (TM, E)
    quant = jnp.dot(onehot, embed_t_ref[...],
                    preferred_element_type=jnp.float32)             # (TM, D)

    q_ref[...] = quant.astype(q_ref.dtype)
    idx_ref[...] = idx

    # per-row squared error; mask padded rows only on the cheap (TM, 1) row sums
    d = quant - x.astype(jnp.float32)
    row_sse = jnp.sum(d * d, axis=-1, keepdims=True)                # (TM, 1)
    row_ids = i * block_rows + jax.lax.broadcasted_iota(
        jnp.int32, (block_rows, 1), 0)                              # (TM, 1)
    row_sse = jnp.where(row_ids < n_valid, row_sse, 0.0)
    sse_ref[...] = jnp.sum(row_sse).reshape(1, 1, 1)


def quantize_forward(x, embed, *, block_rows=256):
    """VQ forward. x: (..., dim), embed: (dim, n_embed).

    Returns (quantize, diff, embed_ind) in the module's default return order.
    """
    dim = x.shape[-1]
    n_embed = embed.shape[-1]
    lead = x.shape[:-1]

    flatten = x.reshape(-1, dim)
    n = flatten.shape[0]

    tm = min(_round_up(block_rows, 8), _round_up(n, 8))
    n_pad = _round_up(n, tm)
    if n_pad != n:
        flatten_p = jnp.pad(flatten, ((0, n_pad - n), (0, 0)))
    else:
        flatten_p = flatten

    embed_t = jnp.transpose(embed, (1, 0))                          # (E, D)
    half_esq = 0.5 * jnp.sum(embed * embed, axis=0, keepdims=True)  # (1, E)

    grid = n_pad // tm

    quant_p, idx_p, sse_p = pl.pallas_call(
        functools.partial(_vq_kernel, n_valid=n, block_rows=tm),
        out_shape=(
            jax.ShapeDtypeStruct((n_pad, dim), x.dtype),
            jax.ShapeDtypeStruct((n_pad, 1), jnp.int32),
            jax.ShapeDtypeStruct((grid, 1, 1), jnp.float32),
        ),
        grid_spec=pltpu.PrefetchScalarGridSpec(
            num_scalar_prefetch=0,
            grid=(grid,),
            in_specs=[
                pl.BlockSpec((tm, dim), lambda i: (i, 0)),
                pl.BlockSpec((dim, n_embed), lambda i: (0, 0)),
                pl.BlockSpec((n_embed, dim), lambda i: (0, 0)),
                pl.BlockSpec((1, n_embed), lambda i: (0, 0)),
            ],
            out_specs=[
                pl.BlockSpec((tm, dim), lambda i: (i, 0)),
                pl.BlockSpec((tm, 1), lambda i: (i, 0)),
                pl.BlockSpec((1, 1, 1), lambda i: (i, 0, 0)),
            ],
        ),
        compiler_params=pltpu.CompilerParams(
            dimension_semantics=("parallel",)),      # no revisited blocks -> shardable
    )(flatten_p, embed, embed_t, half_esq)

    quant = quant_p[:n].reshape(x.shape)
    embed_ind = idx_p[:n, 0].reshape(lead)
    diff = jnp.sum(sse_p) / (n * dim)

    # straight-through estimator: forward value is the quantized vector
    quant = x + jax.lax.stop_gradient(quant - x)
    return quant, diff, embed_ind


def _reference(x, embed):
    """Pure-JAX mirror of the PyTorch Quantize.forward (eval mode)."""
    dim = embed.shape[0]
    flatten = x.reshape(-1, dim)
    dist = (jnp.sum(flatten * flatten, axis=1, keepdims=True)
            - 2.0 * jnp.dot(flatten, embed, precision=jax.lax.Precision.HIGHEST)
            + jnp.sum(embed * embed, axis=0, keepdims=True))
    embed_ind = jnp.argmax(-dist, axis=1)
    quantize = jnp.take(embed.T, embed_ind, axis=0).reshape(x.shape)
    diff = jnp.mean((quantize - x) ** 2)
    embed_ind = embed_ind.reshape(x.shape[:-1])
    return quantize, diff, embed_ind


if __name__ == "__main__":
    key = jax.random.PRNGKey(0)
    kc, ke, kn = jax.random.split(key, 3)

    B, S, DIM, N_EMBED = 2, 48, 128, 256
    embed = jax.random.normal(ke, (DIM, N_EMBED), dtype=jnp.float32)
    # build inputs near actual codebook entries so the nearest code is unambiguous
    chosen = jax.random.randint(kc, (B, S), 0, N_EMBED)
    x = (jnp.take(embed.T, chosen.reshape(-1), axis=0).reshape(B, S, DIM)
         + 0.05 * jax.random.normal(kn, (B, S, DIM), dtype=jnp.float32))

    quant, diff, idx = quantize_forward(x, embed, block_rows=64)
    quant = jax.block_until_ready(quant)

    q_ref, d_ref, i_ref = _reference(x, embed)

    assert quant.shape == x.shape, quant.shape
    assert idx.shape == (B, S), idx.shape
    assert jnp.array_equal(idx, i_ref), "nearest-code index mismatch"
    assert jnp.allclose(quant, q_ref, atol=1e-4, rtol=1e-4), float(
        jnp.max(jnp.abs(quant - q_ref)))
    assert jnp.allclose(diff, d_ref, rtol=1e-3, atol=1e-6), (float(diff), float(d_ref))

    # TODO(synk): training-time EMA codebook updates, distributed all_reduce, and the
    # balancing-heuristic code resets are stateful/training-only and are not implemented.
    print("KERNEL_OK")
</pallas_src>

<mosaic_0001>
module attributes {stable_mosaic.version = 11 : i64} {
  func.func @_vq_kernel(%arg0: i32, %arg1: memref<64x128xf32, #tpu.memory_space<vmem>>, %arg2: memref<128x256xf32, #tpu.memory_space<vmem>>, %arg3: memref<256x128xf32, #tpu.memory_space<vmem>>, %arg4: memref<1x256xf32, #tpu.memory_space<vmem>>, %arg5: memref<64x128xf32, #tpu.memory_space<vmem>>, %arg6: memref<64x1xi32, #tpu.memory_space<vmem>>, %arg7: memref<1x1x1xf32, #tpu.memory_space<vmem>>) attributes {dimension_semantics = [#tpu.dimension_semantics<parallel>], iteration_bounds = array<i64: 2>, scalar_prefetch = 0 : i64, scratch_operands = 0 : i64, tpu.core_type = #tpu.core_type<tc>, window_params = [{transform_indices = @transform_0, window_bounds = array<i64: 64, 128>}, {pipeline_mode = #tpu.pipeline_mode<synchronous>, transform_indices = @transform_1, window_bounds = array<i64: 128, 256>}, {pipeline_mode = #tpu.pipeline_mode<synchronous>, transform_indices = @transform_2, window_bounds = array<i64: 256, 128>}, {pipeline_mode = #tpu.pipeline_mode<synchronous>, transform_indices = @transform_3, window_bounds = array<i64: 1, 256>}, {transform_indices = @transform_4, window_bounds = array<i64: 64, 128>}, {transform_indices = @transform_5, window_bounds = array<i64: 64, 1>}, {transform_indices = @transform_6, window_bounds = array<i64: 1, 1, 1>}]} {
    %c0 = arith.constant 0 : index
    %c0_0 = arith.constant 0 : index
    %0 = vector.load %arg1[%c0, %c0_0] : memref<64x128xf32, #tpu.memory_space<vmem>>, vector<64x128xf32>
    %c0_1 = arith.constant 0 : index
    %c0_2 = arith.constant 0 : index
    %1 = vector.load %arg2[%c0_1, %c0_2] : memref<128x256xf32, #tpu.memory_space<vmem>>, vector<128x256xf32>
    %cst = arith.constant dense<0.000000e+00> : vector<64x256xf32>
    %2 = tpu.matmul %0, %1, %cst {dimension_numbers = #tpu.dot_dimension_numbers<[1], [0], [0], [1], [0, 0, 1, 1], [], []>} : vector<64x128xf32>, vector<128x256xf32>, vector<64x256xf32> -> vector<64x256xf32>
    %c0_3 = arith.constant 0 : index
    %c0_4 = arith.constant 0 : index
    %3 = vector.load %arg4[%c0_3, %c0_4] : memref<1x256xf32, #tpu.memory_space<vmem>>, vector<1x256xf32>
    %4 = vector.broadcast %3 : vector<1x256xf32> to vector<64x256xf32>
    %5 = arith.subf %2, %4 : vector<64x256xf32>
    %6 = tpu.iota {dimensions = array<i32: 1>} : vector<64x256xi32>
    %cst_5 = arith.constant dense<0xFF800000> : vector<64xf32>
    %7 = vector.multi_reduction <maximumf>, %5, %cst_5 [1] : vector<64x256xf32> to vector<64xf32>
    %8 = vector.shape_cast %7 : vector<64xf32> to vector<64x1xf32>
    %9 = vector.broadcast %8 : vector<64x1xf32> to vector<64x256xf32>
    %10 = arith.cmpf oeq, %5, %9 : vector<64x256xf32>
    %c256_i32 = arith.constant 256 : i32
    %11 = vector.broadcast %c256_i32 : i32 to vector<64x256xi32>
    %12 = arith.select %10, %6, %11 : vector<64x256xi1>, vector<64x256xi32>
    %cst_6 = arith.constant dense<2147483647> : vector<64xi32>
    %13 = vector.multi_reduction <minsi>, %12, %cst_6 [1] : vector<64x256xi32> to vector<64xi32>
    %14 = vector.shape_cast %13 : vector<64xi32> to vector<64x1xi32>
    %15 = vector.broadcast %14 : vector<64x1xi32> to vector<64x256xi32>
    %16 = arith.cmpi eq, %6, %15 : vector<64x256xi32>
    %17 = arith.extui %16 : vector<64x256xi1> to vector<64x256xi32>
    %18 = arith.sitofp %17 : vector<64x256xi32> to vector<64x256xf32>
    %c0_7 = arith.constant 0 : index
    %c0_8 = arith.constant 0 : index
    %19 = vector.load %arg3[%c0_7, %c0_8] : memref<256x128xf32, #tpu.memory_space<vmem>>, vector<256x128xf32>
    %cst_9 = arith.constant dense<0.000000e+00> : vector<64x128xf32>
    %20 = tpu.matmul %18, %19, %cst_9 {dimension_numbers = #tpu.dot_dimension_numbers<[1], [0], [0], [1], [0, 0, 1, 1], [], []>} : vector<64x256xf32>, vector<256x128xf32>, vector<64x128xf32> -> vector<64x128xf32>
    %c0_10 = arith.constant 0 : index
    %c0_11 = arith.constant 0 : index
    %21 = vector.load %arg5[%c0_10, %c0_11] : memref<64x128xf32, #tpu.memory_space<vmem>>, vector<64x128xf32>
    tpu.vector_store %arg5[%c0_10, %c0_11], %20 {strides = array<i32>} : memref<64x128xf32, #tpu.memory_space<vmem>>, vector<64x128xf32>,
    %c0_12 = arith.constant 0 : index
    %c0_13 = arith.constant 0 : index
    %22 = vector.load %arg6[%c0_12, %c0_13] : memref<64x1xi32, #tpu.memory_space<vmem>>, vector<64x1xi32>
    tpu.vector_store %arg6[%c0_12, %c0_13], %14 {strides = array<i32>} : memref<64x1xi32, #tpu.memory_space<vmem>>, vector<64x1xi32>,
    %23 = arith.subf %20, %0 : vector<64x128xf32>
    %24 = arith.mulf %23, %23 : vector<64x128xf32>
    %cst_14 = arith.constant dense<0.000000e+00> : vector<64xf32>
    %25 = vector.multi_reduction <add>, %24, %cst_14 [1] : vector<64x128xf32> to vector<64xf32>
    %26 = vector.shape_cast %25 : vector<64xf32> to vector<64x1xf32>
    %c64_i32 = arith.constant 64 : i32
    %27 = arith.muli %arg0, %c64_i32 : i32
    %28 = tpu.iota {dimensions = array<i32: 0>} : vector<64x1xi32>
    %29 = vector.broadcast %27 : i32 to vector<64x1xi32>
    %30 = arith.addi %29, %28 : vector<64x1xi32>
    %c96_i32 = arith.constant 96 : i32
    %31 = vector.broadcast %c96_i32 : i32 to vector<64x1xi32>
    %32 = arith.cmpi slt, %30, %31 : vector<64x1xi32>
    %cst_15 = arith.constant 0.000000e+00 : f32
    %33 = vector.broadcast %cst_15 : f32 to vector<64x1xf32>
    %34 = arith.select %32, %26, %33 : vector<64x1xi1>, vector<64x1xf32>
    %35 = vector.shape_cast %34 : vector<64x1xf32> to vector<1x64x1xf32>
    %cst_16 = arith.constant dense<0.000000e+00> : vector<1xf32>
    %36 = vector.multi_reduction <add>, %35, %cst_16 [1, 2] : vector<1x64x1xf32> to vector<1xf32>
    %37 = vector.shape_cast %36 : vector<1xf32> to vector<1x1x1xf32>
    %38 = vector.extract %37[0, 0, 0] : f32 from vector<1x1x1xf32>
    %39 = vector.broadcast %38 : f32 to vector<1x1x1xf32>
    %c0_17 = arith.constant 0 : index
    %c0_18 = arith.constant 0 : index
    %c0_19 = arith.constant 0 : index
    %40 = vector.load %arg7[%c0_17, %c0_18, %c0_19] : memref<1x1x1xf32, #tpu.memory_space<vmem>>, vector<1x1x1xf32>
    tpu.vector_store %arg7[%c0_17, %c0_18, %c0_19], %39 {strides = array<i32>} : memref<1x1x1xf32, #tpu.memory_space<vmem>>, vector<1x1x1xf32>,
    return
  }
  func.func @transform_0(%arg0: i32) -> (i32, i32) {
    %c0_i32 = arith.constant 0 : i32
    %c0_i32_0 = arith.constant 0 : i32
    return %arg0, %c0_i32 : i32, i32
  }
  func.func @transform_1(%arg0: i32) -> (i32, i32) {
    %c0_i32 = arith.constant 0 : i32
    %c0_i32_0 = arith.constant 0 : i32
    %c0_i32_1 = arith.constant 0 : i32
    return %c0_i32, %c0_i32_0 : i32, i32
  }
  func.func @transform_2(%arg0: i32) -> (i32, i32) {
    %c0_i32 = arith.constant 0 : i32
    %c0_i32_0 = arith.constant 0 : i32
    %c0_i32_1 = arith.constant 0 : i32
    return %c0_i32, %c0_i32_0 : i32, i32
  }
  func.func @transform_3(%arg0: i32) -> (i32, i32) {
    %c0_i32 = arith.constant 0 : i32
    %c0_i32_0 = arith.constant 0 : i32
    %c0_i32_1 = arith.constant 0 : i32
    return %c0_i32, %c0_i32_0 : i32, i32
  }
  func.func @transform_4(%arg0: i32) -> (i32, i32) {
    %c0_i32 = arith.constant 0 : i32
    %c0_i32_0 = arith.constant 0 : i32
    return %arg0, %c0_i32 : i32, i32
  }
  func.func @transform_5(%arg0: i32) -> (i32, i32) {
    %c0_i32 = arith.constant 0 : i32
    %c0_i32_0 = arith.constant 0 : i32
    return %arg0, %c0_i32 : i32, i32
  }
  func.func @transform_6(%arg0: i32) -> (i32, i32, i32) {
    %c0_i32 = arith.constant 0 : i32
    %c0_i32_0 = arith.constant 0 : i32
    %c0_i32_1 = arith.constant 0 : i32
    return %arg0, %c0_i32, %c0_i32_0 : i32, i32, i32
  }
}

</mosaic_0001>

<bundles_post_ra>
// kernel: tpu_custom_call.1
= control target key start
LH: loop header
LB: loop body
LE: loop exit
PB: predicated region body
PF: predicated region fallthrough
CT: control target
= control target key end

     0   :  { %12 = vsyncpa [#allocation3], 0  ;;  %s2150_s0 = inlined_call_operand.hbm [shape: f32[128,128], index: 0, kind: input, shape index: {}]   ;;  %s2151_s1 = inlined_call_operand.hbm [shape: f32[128,256], index: 1, kind: input, shape index: {}]   ;;  %s2152_s2 = inlined_call_operand.hbm [shape: f32[256,128], index: 2, kind: input, shape index: {}]   ;;  %s2153_s3 = inlined_call_operand.vmem [shape: f32[1,256], index: 3, kind: input, shape index: {}]   ;;  %s2154_s4 = inlined_call_operand.hbm [shape: f32[128,128], index: 4, kind: output, shape index: {0}]   ;;  %s2155_s5 = inlined_call_operand.vmem [shape: s32[128,1], index: 5, kind: output, shape index: {1}]   ;;  %s2156_s6 = inlined_call_operand.vmem [shape: f32[2,1,1], index: 6, kind: output, shape index: {2}]  }
   0x1   :  { %14 = vsyncpa [#allocation3 + $0x1], 0 }
   0x2   :  { %15 = vsyncpa [#allocation6], 0 }
   0x3   :  { %16 = vsyncpa [#allocation4], 0 }
   0x4   :  { %18 = vsyncpa [#allocation4 + $0x1], 0  ;;  %s1609_s21 = smov 0   ;;  %s1611_s22 = smov 0  }
   0x5   :  { %s1613_s23 = smov 0   ;;  %s1615_s24 = smov 0  }
   0x6 LB: > { %s1630_s25 = sadd.s32 4294967295, %s1560_s24   ;;  %s1152_s26 = sadd.s32 4294967294, %s1560_s24   ;;  %s1560_s24 = sphi %s1615_s24, %s2176_s24   ;;  %s1556_s23 = sphi %s1613_s23, %s2175_s23   ;;  %s1552_s22 = sphi %s1611_s22, %s2174_s22   ;;  %s1548_s21 = sphi %s1609_s21, %s2173_s21  }
   0x7   : > { %p44_p0 = scmp.ne.s32.totalorder %s1552_s22, %s1548_s21  ;;  %p2157_p1 = scmp.eq.s32.totalorder %s1630_s25, 0 }
   0x8   : > { %p137_p3 = scmp.eq.s32.totalorder %s1152_s26, 1  ;;  %p1153_p5 = scmp.ge.s32.totalorder %s1560_s24, 1 }
   0x9   : > { %p1639_p4 = por %p2157_p1, %p44_p0  ;;  %p196_p7 = scmp.lt.s32.totalorder %s1560_s24, 3 }
   0xa   : > { %p1644_p6 = por %p137_p3, %p44_p0  ;;  %s1562_s30 = smov [#allocation5]  }
   0xb   : > { %s2160_s27 = scalar_select %p1639_p4, 1, 0 }
   0xc   : > { %s2161_s28 = scalar_select %p1644_p6, 1, 0 }
   0xd   : > { %p1649_p8 = pnand %p1153_p5, %p196_p7  ;;  %s208_s7 = sshll.u32 %s1562_s30, 4  ;;  %s1653_s7 = int_to_ptr.vmem [resolvable:$true] %s208_s7 }
   0xe   : > { %s1563_s9 = smov [#allocation7]   ;;  %s1404_s13 = scalar_lea.hbm %s2151_s1, 4096 }
   0xf   : > { %p1341_p9 = pneg %p1649_p8  ;;  %s221_s10 = sshll.u32 %s1563_s9, 4  ;;  %s1664_s10 = int_to_ptr.vmem [resolvable:$true] %s221_s10 }
  0x10   : > { %p1405_p12 = scmp.ne.s32.totalorder %s2151_s1, %s1404_s13  ;;  %p1411_p5 = scmp.lt.u32.totalorder %s1404_s13, %s2151_s1 }
  0x11   : > { %p1660_p11 = pnand %p1341_p9, %p2157_p1 }
  0x13   : > { %p1406_p13 = pneg %p1660_p11 }
  0x15   : > { %p1407_p0 = pnand %p1406_p13, %p1405_p12 }
  0x17   : > { %p1408_p3 = pneg %p1407_p0 }
  0x19   : > { %p1413_p7 = pnand %p1411_p5, %p1408_p3 }
  0x1b   : > { %1416 = shalt.err (!%p1413_p7)
}
  0x1c   : > { %s1417_s18 = scalar_lea.vmem %s1653_s7, 4096  ;;  %p1425_p2 = scmp.lt.s32.totalorder %s1653_s7, %s1653_s7 }
  0x1d   : > { %p1418_p9 = scmp.ne.s32.totalorder %s1653_s7, %s1417_s18  ;;  %p1426_p12 = scmp.lt.s32.totalorder %s1417_s18, %s1417_s18 }
  0x1f   : > { %p1420_p10 = pnand %p1418_p9, %p1406_p13  ;;  %p1427_p0 = por %p1426_p12, %p1425_p2 }
  0x21   : > { %p1421_p1 = pneg %p1420_p10 }
  0x23   : > { %p1428_p6 = pnand %p1427_p0, %p1421_p1 }
  0x25   : > { %1431 = shalt.err (!%p1428_p6)
}
  0x26   : > { %s1564_s19 = smov 256   ;;  %s1565_s20 = smov 16  }
  0x27   : > { %1344 = dma.hbm_to_vmem [thread:$0]  (!%p1660_p11), %s2151_s1, 4096, %s1653_s7, [#allocation6], %s1564_s19, %s1564_s19, %s1565_s20  }
  0x28   : > { %s1432_s12 = scalar_lea.hbm %s2152_s2, 4096 }
  0x29   : > { %p1433_p2 = scmp.ne.s32.totalorder %s2152_s2, %s1432_s12  ;;  %p1439_p10 = scmp.lt.u32.totalorder %s1432_s12, %s2152_s2 }
  0x2b   : > { %p1435_p1 = pnand %p1433_p2, %p1406_p13 }
  0x2d   : > { %p1436_p6 = pneg %p1435_p1 }
  0x2f   : > { %p1441_p3 = pnand %p1439_p10, %p1436_p6 }
  0x31   : > { %1444 = shalt.err (!%p1441_p3)
}
  0x32   : > { %s1445_s7 = scalar_lea.vmem %s1664_s10, 4096  ;;  %p1453_p12 = scmp.lt.s32.totalorder %s1664_s10, %s1664_s10 }
  0x33   : > { %p1446_p5 = scmp.ne.s32.totalorder %s1664_s10, %s1445_s7  ;;  %p1454_p0 = scmp.lt.s32.totalorder %s1445_s7, %s1445_s7 }
  0x35   : > { %p1448_p7 = pnand %p1446_p5, %p1406_p13  ;;  %p1455_p2 = por %p1454_p0, %p1453_p12 }
  0x37   : > { %p1449_p9 = pneg %p1448_p7 }
  0x39   : > { %p1456_p1 = pnand %p1455_p2, %p1449_p9 }
  0x3b   : > { %1459 = shalt.err (!%p1456_p1)
}
  0x3c   : > { %s1566_s17 = smov 128   ;;  %s1567_s18 = smov 8  }
  0x3d   : > { %1347 = dma.hbm_to_vmem [thread:$0]  (!%p1660_p11), %s2152_s2, 4096, %s1664_s10, [#allocation6], %s1566_s17, %s1566_s17, %s1567_s18  }
  0x3e   : > { %s1722_s26 = sadd.s32 1, %s1560_s24   ;;  %s31_s9 = sadd.s32 1, %s1556_s23 }
  0x3f   : > { %s28_s30 = ssub.s32 %s1560_s24, %s1722_s26  ;;  %p38_p6 = scmp.ne.s32.totalorder %s1556_s23, %s1552_s22 }
  0x40   : > { %p29_p13 = scmp.eq.s32.totalorder %s28_s30, 0  ;;  %p39_p10 = scmp.eq.s32.totalorder %s1560_s24, 0 }
  0x41   : > { %p2164_p5 = scmp.eq.s32.totalorder %s1630_s25, 1  ;;  %p1358_p9 = scmp.lt.s32.totalorder %s1560_s24, 2 }
  0x42   : > { %s1731_s11 = scalar_select %p29_p13, %s1556_s23, %s31_s9  }
  0x43   : > { %p40_p3 = por %p39_p10, %p38_p6  ;;  %p1735_p7 = por %p2164_p5, %p38_p6 }
  0x44   : > { %s238_s12 = sand.u32 1, %s1556_s23   ;;  %s1205_s10 = sshll.u32 %s1560_s24, 10 }
  0x45   : > { %s2165_s8 = scalar_select %p1735_p7, 1, 0 }
  0x46   : > { %s1157_s13 = sshll.u32 %s238_s12, 6  ;;  %s1745_s16 = scalar_lea.hbm %s2150_s0, %s1205_s10 }
  0x47   : > { %s242_s7 = scalar_lea.vmem [#allocation2], %s1157_s13  ;;  %p1749_p11 = pnand %p1358_p9, %p40_p3 }
  0x48   : > { %s249_s19 = sshll.u32 %s242_s7, 4  ;;  %s1753_s30 = scalar_lea.sflag [#allocation3], %s238_s12  ;;  %s1747_s19 = int_to_ptr.vmem [resolvable:$true] %s249_s19 }
  0x49   : > { %s1460_s9 = scalar_lea.hbm %s1745_s16, 1024  ;;  %p1462_p0 = pneg %p1749_p11 }
  0x4a   : > { %p1461_p12 = scmp.ne.s32.totalorder %s1745_s16, %s1460_s9  ;;  %s1465_s14 = scalar_lea.hbm %s2150_s0, 2048 }
  0x4b   : > { %p1466_p13 = scmp.lt.u32.totalorder %s1745_s16, %s2150_s0  ;;  %p1467_p6 = scmp.lt.u32.totalorder %s1465_s14, %s1460_s9 }
  0x4c   : > { %p1463_p2 = pnand %p1462_p0, %p1461_p12  ;;  %p1469_p3 = scmp.lt.u32.totalorder %s1460_s9, %s1745_s16 }
  0x4d   : > { %p1468_p10 = por %p1467_p6, %p1466_p13 }
  0x4e   : > { %p1464_p1 = pneg %p1463_p2 }
  0x4f   : > { %p1470_p5 = por %p1469_p3, %p1468_p10 }
  0x51   : > { %p1471_p9 = pnand %p1470_p5, %p1464_p1 }
  0x53   : > { %1474 = shalt.err (!%p1471_p9)
}
  0x54   : > { %s1475_s12 = scalar_lea.vmem %s1747_s19, 1024  ;;  %s1568_s13 = smov [#allocation2]  }
  0x55   : > { %p1476_p12 = scmp.ne.s32.totalorder %s1747_s19, %s1475_s12  ;;  %s1480_s10 = sshll.u32 %s1568_s13, 4  ;;  %s1481_s10 = int_to_ptr.vmem [resolvable:$false] %s1480_s10 }
  0x56   : > { %s1482_s15 = scalar_lea.vmem %s1481_s10, 2048  ;;  %p1483_p4 = scmp.lt.s32.totalorder %s1747_s19, %s1481_s10 }
  0x57   : > { %p1478_p2 = pnand %p1476_p12, %p1462_p0  ;;  %p1484_p13 = scmp.lt.s32.totalorder %s1482_s15, %s1475_s12 }
  0x59   : > { %p1479_p7 = pneg %p1478_p2  ;;  %p1485_p6 = por %p1484_p13, %p1483_p4 }
  0x5b   : > { %p1486_p10 = pnand %p1485_p6, %p1479_p7 }
  0x5d   : > { %1489 = shalt.err (!%p1486_p10)
}
  0x5e   : > { %1351 = dma.hbm_to_vmem [thread:$0]  (!%p1749_p11), %s1745_s16, 1024, %s1747_s19, %s1753_s30, %s1566_s17, %s1566_s17, %s1567_s18  }
  0x5f   : > { %261 = sbr.rel (%p1649_p8) target bundleno = 1399 (0x577), region = 36  ;;  %s1787_s9 = sand.u32 (!%p1649_p8), 1, %s1552_s22  }
  0x60   : > { %s1161_s14 = sshll.u32 (!%p1649_p8), %s1787_s9, 6  ;;  %s264_s7 = scalar_lea.sflag (!%p1649_p8), [#allocation3], %s1787_s9 }
  0x61   : > { %s1793_s20 = scalar_lea.vmem (!%p1649_p8), [#allocation2], %s1161_s14  ;;  %p2167_p4 = scmp.ne.s32.totalorder (!%p1649_p8), %s2160_s27, 0 }
  0x66   : > { %1535 = dma.done.wait (%p2167_p4), %s264_s7, 1024  }
  0x67   : > { %1537 = vsyncadd (%p2167_p4), %s264_s7, 4294966272  ;;  %p2168_p7 = scmp.eq.s32.totalorder %s1630_s25, 0 }
  0x69   : > { %1539 = dma.done.wait (%p2168_p7), [#allocation6], 8192   ;;  %p2169_p8 = pmov %p2168_p7 }
  0x6a   : > { %v1569_v0 = vmov 0.0   ;;  %v332_v1 = vld [vmem:[#allocation5 + $0x8] sm:$0xff]  ;;  %v334_v2 = vld [vmem:[#allocation5 + $0x18] sm:$0xff]  ;;  %v331_v3 = vld [vmem:[#allocation5] sm:$0xff]  ;;  %v478_v57 = vlaneseq  ;;  %s1165_s17 = sshll.u32 %s1630_s25, 3  ;;  %s2059_s12 = scalar_lea.vmem [#allocation8], %s1161_s14 }
  0x6b   : > { %1541 = vsyncadd (%p2169_p8), [#allocation6], 4294959104  ;;  %427 = vmatprep.mubr.f32.mxu0 %v1569_v0  ;;  %v1263_v4 = vpack.c.bf16 %v334_v2, %v332_v1  ;;  %v333_v5 = vld [vmem:[#allocation5 + $0x10] sm:$0xff]  ;;  %v336_v6 = vld [vmem:[#allocation5 + $0x28] sm:$0xff]  ;;  %p315_p11 = scmp.lt.s32.totalorder %s1165_s17, 15  ;;  %s1199_s13 = sshll.u32 %s1630_s25, 6 }
  0x6c   : > { %v338_v7 = vld [vmem:[#allocation5 + $0x38] sm:$0xff]  ;;  %v1265_v8 = vpack.c.bf16 %v333_v5, %v331_v3  ;;  %v335_v10 = vld [vmem:[#allocation5 + $0x20] sm:$0xff]  ;;  %v337_v11 = vld [vmem:[#allocation5 + $0x30] sm:$0xff]  ;;  %v1843_v58 = vshrl.u32 %v478_v57, 7  ;;  %s1009_s10 = sshll.u32 %s2059_s12, 4  ;;  %s1206_s15 = sshll.u32 %s1630_s25, 10  ;;  %s2095_s10 = int_to_ptr.vmem [resolvable:$true] %s1009_s10 }
  0x6d   : > { %v1267_v9 = vpack.c.bf16 %v338_v7, %v336_v6  ;;  %v340_v12 = vld [vmem:[#allocation5 + $0x48] sm:$0xff]  ;;  %1264 = vmatprep.subr.bf16.mxu0 %v1263_v4  ;;  %v342_v13 = vld [vmem:[#allocation5 + $0x58] sm:$0xff]  ;;  %v1269_v14 = vpack.c.bf16 %v337_v11, %v335_v10  ;;  %v339_v16 = vld [vmem:[#allocation5 + $0x40] sm:$0xff]  ;;  %s2178_s17 = smov (!%p315_p11, %s1165_s17), 15  ;;  %s988_s27 = scalar_lea.sflag [#allocation4], %s1787_s9 }
  0x6e   : > { %1266 = vmatpush1.bf16.msra.mxu0 %v1265_v8  ;;  %v1271_v15 = vpack.c.bf16 %v342_v13, %v340_v12  ;;  %v341_v17 = vld [vmem:[#allocation5 + $0x50] sm:$0xff]  ;;  %v344_v18 = vld [vmem:[#allocation5 + $0x68] sm:$0xff]  ;;  %v346_v19 = vld [vmem:[#allocation5 + $0x78] sm:$0xff]  ;;  %v480_v59 = vsub.s32 0, %v1843_v58  ;;  %v484_v61 = vsub.s32 1, %v1843_v58  ;;  %s1166_s18 = sshll.u32 %s2178_s17, 3 }
  0x6f   : > { %1268 = vmatprep.subr.bf16.mxu0 %v1267_v9  ;;  %v1273_v20 = vpack.c.bf16 %v341_v17, %v339_v16  ;;  %v1275_v21 = vpack.c.bf16 %v346_v19, %v344_v18  ;;  %v343_v22 = vld [vmem:[#allocation5 + $0x60] sm:$0xff]  ;;  %v345_v23 = vld [vmem:[#allocation5 + $0x70] sm:$0xff]  ;;  %v348_v24 = vld [vmem:[#allocation5 + $0x88] sm:$0xff]  ;;  %s2001_s30 = scalar_lea.vmem %s2155_s5, %s1166_s18  ;;  %s1490_s29 = scalar_lea.vmem %s2095_s10, 1024 }
  0x70   : > { %v350_v25 = vld [vmem:[#allocation5 + $0x98] sm:$0xff]  ;;  %v1277_v26 = vpack.c.bf16 %v345_v23, %v343_v22  ;;  %v347_v28 = vld [vmem:[#allocation5 + $0x80] sm:$0xff]  ;;  %v349_v29 = vld [vmem:[#allocation5 + $0x90] sm:$0xff]  ;;  %p1491_p0 = scmp.ne.s32.totalorder %s2095_s10, %s1490_s29  ;;  %p2170_p1 = scmp.ne.s32.totalorder %s2165_s8, 0 }
  0x71   : > { %v1279_v27 = vpack.c.bf16 %v350_v25, %v348_v24  ;;  %v352_v30 = vld [vmem:[#allocation5 + $0xa8] sm:$0xff]  ;;  %v354_v31 = vld [vmem:[#allocation5 + $0xb8] sm:$0xff]  ;;  %v1281_v32 = vpack.c.bf16 %v349_v29, %v347_v28  ;;  %v351_v34 = vld [vmem:[#allocation5 + $0xa0] sm:$0xff]  ;;  %s1571_s17 = smov [#allocation8]  }
  0x72   : > { %1270 = vmatpush1.bf16.msra.mxu0 %v1269_v14  ;;  %v1283_v33 = vpack.c.bf16 %v354_v31, %v352_v30  ;;  %v353_v35 = vld [vmem:[#allocation5 + $0xb0] sm:$0xff]  ;;  %v356_v36 = vld [vmem:[#allocation5 + $0xc8] sm:$0xff]  ;;  %v358_v37 = vld [vmem:[#allocation5 + $0xd8] sm:$0xff]  ;;  %p1492_p3 = pnand %p1491_p0, %p2170_p1  ;;  %s1494_s18 = sshll.u32 %s1571_s17, 4  ;;  %s1495_s18 = int_to_ptr.vmem [resolvable:$false] %s1494_s18 }
  0x73   : > { %1272 = vmatprep.subr.bf16.mxu0 %v1271_v15  ;;  %v1285_v38 = vpack.c.bf16 %v353_v35, %v351_v34  ;;  %v1287_v39 = vpack.c.bf16 %v358_v37, %v356_v36  ;;  %v355_v40 = vld [vmem:[#allocation5 + $0xc0] sm:$0xff]  ;;  %v357_v41 = vld [vmem:[#allocation5 + $0xd0] sm:$0xff]  ;;  %v360_v42 = vld [vmem:[#allocation5 + $0xe8] sm:$0xff]  ;;  %s1496_s16 = scalar_lea.vmem %s1495_s18, 2048  ;;  %p1497_p9 = scmp.lt.s32.totalorder %s2095_s10, %s1495_s18 }
  0x74   : > { %v362_v43 = vld [vmem:[#allocation5 + $0xf8] sm:$0xff]  ;;  %v1289_v44 = vpack.c.bf16 %v357_v41, %v355_v40  ;;  %v359_v46 = vld [vmem:[#allocation5 + $0xe0] sm:$0xff]  ;;  %v361_v47 = vld [vmem:[#allocation5 + $0xf0] sm:$0xff]  ;;  %v1880_v40 = vand.u32 127, %v478_v57  ;;  %p1493_p5 = pneg %p1492_p3  ;;  %p1498_p12 = scmp.lt.s32.totalorder %s1496_s16, %s1490_s29 }
  0x75   : > { %v1291_v45 = vpack.c.bf16 %v362_v43, %v360_v42  ;;  %v1293_v48 = vpack.c.bf16 %v361_v47, %v359_v46  ;;  %v1805_v49 = vld [vmem:[%s1793_s20] sm:$0xff]  ;;  %v1810_v50 = vld [vmem:[%s1793_s20 + $0x8] sm:$0xff]  ;;  %v1815_v51 = vld [vmem:[%s1793_s20 + $0x10] sm:$0xff] }
  0x76   : > { %1274 = vmatpush1.bf16.msra.mxu0 %v1273_v20  ;;  %v1820_v52 = vld [vmem:[%s1793_s20 + $0x18] sm:$0xff]  ;;  %v1825_v53 = vld [vmem:[%s1793_s20 + $0x20] sm:$0xff]  ;;  %v1830_v54 = vld [vmem:[%s1793_s20 + $0x28] sm:$0xff]  ;;  %v1883_v41 = vadd.s32 128, %v1880_v40  ;;  %p1499_p2 = por %p1498_p12, %p1497_p9 }
  0x77   : > { %1276 = vmatprep.subr.bf16.mxu0 %v1275_v21  ;;  %v1835_v55 = vld [vmem:[%s1793_s20 + $0x30] sm:$0xff]  ;;  %v1840_v56 = vld [vmem:[%s1793_s20 + $0x38] sm:$0xff]  ;;  %v476_v60 = vld [vmem:[%s2153_s3] sm:$0x3]  ;;  %s2101_s20 = scalar_lea.hbm %s2154_s4, %s1206_s15 }
  0x78   : > { %v481_v62 = vrot.slane %v476_v60, %v480_v59  ;;  %v485_v63 = vrot.slane %v476_v60, %v484_v61  ;;  %p1500_p13 = pnand %p1499_p2, %p1493_p5 }
  0x7a   : > { %1278 = vmatpush1.bf16.msra.mxu0 %v1277_v26 }
  0x7b   : > { %1280 = vmatprep.subr.bf16.mxu0 %v1279_v27 }
  0x7e   : > { %1282 = vmatpush1.bf16.msra.mxu0 %v1281_v32 }
  0x7f   : > { %1284 = vmatprep.subr.bf16.mxu0 %v1283_v33 }
  0x82   : > { %1286 = vmatpush1.bf16.msra.mxu0 %v1285_v38 }
  0x83   : > { %1288 = vmatprep.subr.bf16.mxu0 %v1287_v39 }
  0x86   : > { %1290 = vmatpush1.bf16.msra.mxu0 %v1289_v44 }
  0x87   : > { %1292 = vmatprep.subr.bf16.mxu0 %v1291_v45 }
  0x8a   : > { %1294 = vmatpush1.bf16.msra.mxu0 %v1293_v48 }
  0x8d   : > { %428 = vmatmul.mubr.f32.vlgmr.msra.gmra.mrb[0].mxu0 %v1805_v49 }
  0x8e   : > { %433 = vmatprep.mubr.f32.mxu0 %v1569_v0 }
  0x91   : > { %434 = vmatmul.mubr.f32.gmra.mrb[2].mxu0 %v1810_v50 }
  0x92   : > { %439 = vmatprep.mubr.f32.mxu0 %v1569_v0 }
  0x95   : > { %440 = vmatmul.mubr.f32.gmra.mrb[4].mxu0 %v1815_v51 }
  0x96   : > { %445 = vmatprep.mubr.f32.mxu0 %v1569_v0 }
  0x99   : > { %446 = vmatmul.mubr.f32.gmra.mrb[6].mxu0 %v1820_v52 }
  0x9a   : > { %451 = vmatprep.mubr.f32.mxu0 %v1569_v0 }
  0x9d   : > { %452 = vmatmul.mubr.f32.gmra.mrb[8].mxu0 %v1825_v53 }
  0x9e   : > { %457 = vmatprep.mubr.f32.mxu0 %v1569_v0 }
  0xa1   : > { %458 = vmatmul.mubr.f32.gmra.mrb[10].mxu0 %v1830_v54 }
  0xa2   : > { %463 = vmatprep.mubr.f32.mxu0 %v1569_v0 }
  0xa5   : > { %464 = vmatmul.mubr.f32.gmra.mrb[12].mxu0 %v1835_v55 }
  0xa6   : > { %469 = vmatprep.mubr.f32.mxu0 %v1569_v0 }
  0xa9   : > { %470 = vmatmul.mubr.f32.gmra.mrb[14].mxu0 %v1840_v56 }
 0x160   : > { %v429_v1 = vpop.f32.mrb[0].mxu0 }
 0x161   : > { %v488_v2 = vsub.f32 %v429_v1, %v481_v62  ;;  %v431_v0 = vpop.f32.mrb[1].mxu0 }
 0x162   : > { %v489_v3 = vsub.f32 %v431_v0, %v485_v63 }
 0x164   : > { %v435_v4 = vpop.f32.mrb[2].mxu0  ;;  %v507_v5 = vmax.f32 %v488_v2, %v489_v3 }
 0x165   : > { %v490_v6 = vsub.f32 %v435_v4, %v481_v62  ;;  %v437_v7 = vpop.f32.mrb[3].mxu0 }
 0x166   : > { %v491_v8 = vsub.f32 %v437_v7, %v485_v63  ;;  %508 = vmax.xlane.f32.xlu0 %v507_v5 }
 0x168   : > { %v441_v9 = vpop.f32.mrb[4].mxu0  ;;  %v510_v10 = vmax.f32 %v490_v6, %v491_v8 }
 0x169   : > { %v492_v11 = vsub.f32 %v441_v9, %v481_v62  ;;  %v443_v12 = vpop.f32.mrb[5].mxu0 }
 0x16a   : > { %v493_v13 = vsub.f32 %v443_v12, %v485_v63  ;;  %511 = vmax.xlane.f32.xlu0 %v510_v10 }
 0x16c   : > { %v447_v14 = vpop.f32.mrb[6].mxu0  ;;  %v513_v15 = vmax.f32 %v492_v11, %v493_v13 }
 0x16d   : > { %v1850_v16 = vsub.f32 %v447_v14, %v481_v62  ;;  %v449_v17 = vpop.f32.mrb[7].mxu0 }
 0x16e   : > { %v1852_v18 = vsub.f32 %v449_v17, %v485_v63  ;;  %514 = vmax.xlane.f32.xlu1 %v513_v15 }
 0x170   : > { %v453_v19 = vpop.f32.mrb[8].mxu0  ;;  %v516_v20 = vmax.f32 %v1850_v16, %v1852_v18 }
 0x171   : > { %v1856_v21 = vsub.f32 %v453_v19, %v481_v62  ;;  %v455_v22 = vpop.f32.mrb[9].mxu0 }
 0x172   : > { %v1858_v23 = vsub.f32 %v455_v22, %v485_v63  ;;  %517 = vmax.xlane.f32.xlu1 %v516_v20 }
 0x174   : > { %v459_v24 = vpop.f32.mrb[10].mxu0  ;;  %v519_v25 = vmax.f32 %v1856_v21, %v1858_v23 }
 0x175   : > { %v1862_v26 = vsub.f32 %v459_v24, %v481_v62  ;;  %v461_v27 = vpop.f32.mrb[11].mxu0 }
 0x176   : > { %v1864_v28 = vsub.f32 %v461_v27, %v485_v63  ;;  %520 = vmax.xlane.f32.xlu0 %v519_v25 }
 0x178   : > { %v465_v29 = vpop.f32.mrb[12].mxu0  ;;  %v522_v30 = vmax.f32 %v1862_v26, %v1864_v28 }
 0x179   : > { %v1868_v31 = vsub.f32 %v465_v29, %v481_v62  ;;  %v467_v32 = vpop.f32.mrb[13].mxu0 }
 0x17a   : > { %v1870_v33 = vsub.f32 %v467_v32, %v485_v63  ;;  %523 = vmax.xlane.f32.xlu1 %v522_v30 }
 0x17c   : > { %v471_v34 = vpop.f32.mrb[14].mxu0  ;;  %v525_v35 = vmax.f32 %v1868_v31, %v1870_v33 }
 0x17d   : > { %v1874_v36 = vsub.f32 %v471_v34, %v481_v62  ;;  %v473_v37 = vpop.f32.mrb[15].mxu0 }
 0x17e   : > { %v1876_v38 = vsub.f32 %v473_v37, %v485_v63  ;;  %526 = vmax.xlane.f32.xlu0 %v525_v35  ;;  %v755_v35 = vld [vmem:[#allocation7 + $0x80] sm:$0xff] }
 0x17f   : > { %v739_v37 = vld [vmem:[#allocation7] sm:$0xff] }
 0x180   : > { %v528_v39 = vmax.f32 %v1874_v36, %v1876_v38 }
 0x182   : > { %529 = vmax.xlane.f32.xlu1 %v528_v39  ;;  %v740_v39 = vld [vmem:[#allocation7 + $0x8] sm:$0xff] }
 0x1f3   : > { %v509_v42 = vpop.xlane.xlu0 %508 }
 0x1f4   : > { %vm531_vm0 = vcmp.eq.f32.partialorder %v488_v2, %v509_v42  ;;  %vm532_vm1 = vcmp.eq.f32.partialorder %v489_v3, %v509_v42  ;;  %v757_v42 = vld [vmem:[#allocation7 + $0x90] sm:$0xff] }
 0x1f5   : > { %v547_v43 = vsel %vm531_vm0, %v1880_v40, 256  ;;  %v548_v44 = vsel %vm532_vm1, %v1883_v41, 256 }
 0x1f6   : > { %vm563_vm2 = vcmp.lt.s32.totalorder %v547_v43, %v548_v44 }
 0x1f7   : > { %v512_v45 = vpop.xlane.xlu0 %511  ;;  %v1887_v46 = vsel %vm563_vm2, %v547_v43, %v548_v44  ;;  %v758_v43 = vld [vmem:[#allocation7 + $0x98] sm:$0xff]  ;;  %v1297_v44 = vpack.c.bf16 %v740_v39, %v739_v37  ;;  %v751_v37 = vld [vmem:[#allocation7 + $0x60] sm:$0xff] }
 0x1f8   : > { %vm533_vm3 = vcmp.eq.f32.partialorder %v490_v6, %v512_v45  ;;  %vm534_vm4 = vcmp.eq.f32.partialorder %v491_v8, %v512_v45  ;;  %v566_v47 = vshra.s32 %v1887_v46, 16  ;;  %v1299_v45 = vpack.c.bf16 %v758_v43, %v757_v42 }
 0x1f9   : > { %v549_v48 = vsel %vm533_vm3, %v1880_v40, 256  ;;  %v550_v57 = vsel %vm534_vm4, %v1883_v41, 256  ;;  %v565_v42 = vand.u32 65535, %v1887_v46 }
 0x1fa   : > { %vm579_vm5 = vcmp.lt.s32.totalorder %v549_v48, %v550_v57  ;;  %v1892_v59 = vcvt.s32.f32 %v566_v47  ;;  %v741_v47 = vld [vmem:[#allocation7 + $0x10] sm:$0xff] }
 0x1fb   : > { %v515_v60 = vpop.xlane.xlu1 %514  ;;  %v1894_v61 = vsel %vm579_vm5, %v549_v48, %v550_v57  ;;  %v742_v48 = vld [vmem:[#allocation7 + $0x18] sm:$0xff]  ;;  %v759_v57 = vld [vmem:[#allocation7 + $0xa0] sm:$0xff] }
 0x1fc   : > { %vm535_vm6 = vcmp.eq.f32.partialorder %v492_v11, %v515_v60  ;;  %vm536_vm7 = vcmp.eq.f32.partialorder %v493_v13, %v515_v60  ;;  %569 = vmin.xlane.f32.xlu0 %v1892_v59  ;;  %v582_v62 = vshra.s32 %v1894_v61, 16  ;;  %v760_v60 = vld [vmem:[#allocation7 + $0xa8] sm:$0xff] }
 0x1fd   : > { %v551_v63 = vsel %vm535_vm6, %v1880_v40, 256  ;;  %v552_v1 = vsel %vm536_vm7, %v1883_v41, 256 }
 0x1fe   : > { %vm595_vm8 = vcmp.lt.s32.totalorder %v551_v63, %v552_v1  ;;  %v1900_v2 = vcvt.s32.f32 %v582_v62  ;;  %v1301_v62 = vpack.c.bf16 %v742_v48, %v741_v47 }
 0x1ff   : > { %v518_v0 = vpop.xlane.xlu1 %517  ;;  %v1902_v3 = vsel %vm595_vm8, %v551_v63, %v552_v1  ;;  %v1303_v63 = vpack.c.bf16 %v760_v60, %v759_v57  ;;  %v743_v1 = vld [vmem:[#allocation7 + $0x20] sm:$0xff] }
 0x200   : > { %vm537_vm9 = vcmp.eq.f32.partialorder %v1850_v16, %v518_v0  ;;  %vm538_vm10 = vcmp.eq.f32.partialorder %v1852_v18, %v518_v0  ;;  %585 = vmin.xlane.f32.xlu1 %v1900_v2  ;;  %v598_v4 = vshra.s32 %v1902_v3, 16  ;;  %v744_v0 = vld [vmem:[#allocation7 + $0x28] sm:$0xff]  ;;  %v597_v60 = vand.u32 65535, %v1902_v3 }
 0x201   : > { %v553_v5 = vsel %vm537_vm9, %v1880_v40, 256  ;;  %v554_v6 = vsel %vm538_vm10, %v1883_v41, 256 }
 0x202   : > { %vm611_vm11 = vcmp.lt.s32.totalorder %v553_v5, %v554_v6  ;;  %v1910_v7 = vcvt.s32.f32 %v598_v4  ;;  %v761_v4 = vld [vmem:[#allocation7 + $0xb0] sm:$0xff]  ;;  %v599_v46 = vcvt.s32.f32 %v597_v60 }
 0x203   : > { %v521_v8 = vpop.xlane.xlu0 %520  ;;  %v1912_v9 = vsel %vm611_vm11, %v553_v5, %v554_v6  ;;  %v762_v5 = vld [vmem:[#allocation7 + $0xb8] sm:$0xff]  ;;  %v1305_v6 = vpack.c.bf16 %v744_v0, %v743_v1 }
 0x204   : > { %vm539_vm12 = vcmp.eq.f32.partialorder %v1856_v21, %v521_v8  ;;  %vm540_vm13 = vcmp.eq.f32.partialorder %v1858_v23, %v521_v8  ;;  %601 = vmin.xlane.f32.xlu0 %v1910_v7  ;;  %v614_v10 = vshra.s32 %v1912_v9, 16  ;;  %v1307_v8 = vpack.c.bf16 %v762_v5, %v761_v4 }
 0x205   : > { %v555_v11 = vsel %vm539_vm12, %v1880_v40, 256  ;;  %v556_v12 = vsel %vm540_vm13, %v1883_v41, 256  ;;  %v613_v1 = vand.u32 65535, %v1912_v9 }
 0x206   : > { %vm627_vm14 = vcmp.lt.s32.totalorder %v555_v11, %v556_v12  ;;  %v1920_v13 = vcvt.s32.f32 %v614_v10  ;;  %v745_v10 = vld [vmem:[#allocation7 + $0x30] sm:$0xff] }
 0x207   : > { %v524_v14 = vpop.xlane.xlu1 %523  ;;  %v1922_v15 = vsel %vm627_vm14, %v555_v11, %v556_v12  ;;  %v746_v11 = vld [vmem:[#allocation7 + $0x38] sm:$0xff]  ;;  %v763_v12 = vld [vmem:[#allocation7 + $0xc0] sm:$0xff]  ;;  %v615_v0 = vcvt.s32.f32 %v613_v1 }
 0x208   : > { %vm541_vm15 = vcmp.eq.f32.partialorder %v1862_v26, %v524_v14  ;;  %vm542_vm0 = vcmp.eq.f32.partialorder %v1864_v28, %v524_v14  ;;  %617 = vmin.xlane.f32.xlu1 %v1920_v13  ;;  %v630_v16 = vshra.s32 %v1922_v15, 16  ;;  %v764_v14 = vld [vmem:[#allocation7 + $0xc8] sm:$0xff]  ;;  %v629_v3 = vand.u32 65535, %v1922_v15 }
 0x209   : > { %v557_v17 = vsel %vm541_vm15, %v1880_v40, 256  ;;  %v558_v18 = vsel %vm542_vm0, %v1883_v41, 256  ;;  %vm884_vm0 = vcmask 7168  }
 0x20a   : > { %vm643_vm1 = vcmp.lt.s32.totalorder %v557_v17, %v558_v18  ;;  %v1930_v19 = vcvt.s32.f32 %v630_v16  ;;  %v1309_v16 = vpack.c.bf16 %v746_v11, %v745_v10  ;;  %v631_v5 = vcvt.s32.f32 %v629_v3  ;;  %v753_v10 = vld [vmem:[#allocation7 + $0x70] sm:$0xff]  ;;  %v754_v11 = vld [vmem:[#allocation7 + $0x78] sm:$0xff] }
 0x20b   : > { %v527_v20 = vpop.xlane.xlu0 %526  ;;  %v1932_v21 = vsel %vm643_vm1, %v557_v17, %v558_v18  ;;  %v1311_v17 = vpack.c.bf16 %v764_v14, %v763_v12  ;;  %v747_v18 = vld [vmem:[#allocation7 + $0x40] sm:$0xff]  ;;  %v1325_v15 = vpack.c.bf16 %v754_v11, %v753_v10 }
 0x20c   : > { %vm543_vm2 = vcmp.eq.f32.partialorder %v1868_v31, %v527_v20  ;;  %vm544_vm3 = vcmp.eq.f32.partialorder %v1870_v33, %v527_v20  ;;  %633 = vmin.xlane.f32.xlu0 %v1930_v19  ;;  %v646_v22 = vshra.s32 %v1932_v21, 16  ;;  %v748_v20 = vld [vmem:[#allocation7 + $0x48] sm:$0xff]  ;;  %v645_v9 = vand.u32 65535, %v1932_v21 }
 0x20d   : > { %v559_v23 = vsel %vm543_vm2, %v1880_v40, 256  ;;  %v560_v24 = vsel %vm544_vm3, %v1883_v41, 256 }
 0x20e   : > { %vm659_vm4 = vcmp.lt.s32.totalorder %v559_v23, %v560_v24  ;;  %v1940_v25 = vcvt.s32.f32 %v646_v22  ;;  %v765_v22 = vld [vmem:[#allocation7 + $0xd0] sm:$0xff]  ;;  %v647_v14 = vcvt.s32.f32 %v645_v9 }
 0x20f   : > { %v530_v26 = vpop.xlane.xlu1 %529  ;;  %v1942_v27 = vsel %vm659_vm4, %v559_v23, %v560_v24  ;;  %v766_v23 = vld [vmem:[#allocation7 + $0xd8] sm:$0xff]  ;;  %v1313_v24 = vpack.c.bf16 %v748_v20, %v747_v18 }
 0x210   : > { %vm545_vm5 = vcmp.eq.f32.partialorder %v1874_v36, %v530_v26  ;;  %vm546_vm6 = vcmp.eq.f32.partialorder %v1876_v38, %v530_v26  ;;  %649 = vmin.xlane.f32.xlu1 %v1940_v25  ;;  %v662_v28 = vshra.s32 %v1942_v27, 16  ;;  %v756_v36 = vld [vmem:[#allocation7 + $0x88] sm:$0xff]  ;;  %v1315_v26 = vpack.c.bf16 %v766_v23, %v765_v22 }
 0x211   : > { %v561_v29 = vsel %vm545_vm5, %v1880_v40, 256  ;;  %v562_v30 = vsel %vm546_vm6, %v1883_v41, 256  ;;  %v1295_v38 = vpack.c.bf16 %v756_v36, %v755_v35 }
 0x212   : > { %vm675_vm7 = vcmp.lt.s32.totalorder %v561_v29, %v562_v30  ;;  %v1950_v31 = vcvt.s32.f32 %v662_v28  ;;  %v749_v28 = vld [vmem:[#allocation7 + $0x50] sm:$0xff] }
 0x213   : > { %v1952_v32 = vsel %vm675_vm7, %v561_v29, %v562_v30  ;;  %1296 = vmatprep.subr.bf16.mxu1 %v1295_v38  ;;  %v750_v29 = vld [vmem:[#allocation7 + $0x58] sm:$0xff]  ;;  %v767_v30 = vld [vmem:[#allocation7 + $0xe0] sm:$0xff]  ;;  %v752_v38 = vld [vmem:[#allocation7 + $0x68] sm:$0xff] }
 0x214   : > { %665 = vmin.xlane.f32.xlu0 %v1950_v31  ;;  %v678_v33 = vshra.s32 %v1952_v32, 16  ;;  %1298 = vmatpush3.bf16.msra.mxu1 %v1297_v44  ;;  %v1317_v35 = vpack.c.bf16 %v750_v29, %v749_v28  ;;  %v1321_v39 = vpack.c.bf16 %v752_v38, %v751_v37  ;;  %v567_v44 = vcvt.s32.f32 %v565_v42 }
 0x215   : > { %1300 = vmatprep.subr.bf16.mxu1 %v1299_v45  ;;  %v581_v45 = vand.u32 65535, %v1894_v61  ;;  %v677_v18 = vand.u32 65535, %v1952_v32 }
 0x216   : > { %v1956_v34 = vcvt.s32.f32 %v678_v33  ;;  %v768_v33 = vld [vmem:[#allocation7 + $0xe8] sm:$0xff] }
 0x217   : > { %v1319_v36 = vpack.c.bf16 %v768_v33, %v767_v30  ;;  %v583_v57 = vcvt.s32.f32 %v581_v45 }
 0x218   : > { %681 = vmin.xlane.f32.xlu1 %v1956_v34  ;;  %1302 = vmatpush3.bf16.msra.mxu1 %v1301_v62 }
 0x219   : > { %1304 = vmatprep.subr.bf16.mxu1 %v1303_v63 }
 0x21c   : > { %1306 = vmatpush3.bf16.msra.mxu1 %v1305_v6  ;;  %v769_v6 = vld [vmem:[#allocation7 + $0xf0] sm:$0xff] }
 0x21d   : > { %1308 = vmatprep.subr.bf16.mxu1 %v1307_v8  ;;  %v770_v8 = vld [vmem:[#allocation7 + $0xf8] sm:$0xff] }
 0x220   : > { %1310 = vmatpush3.bf16.msra.mxu1 %v1309_v16  ;;  %v661_v16 = vand.u32 65535, %v1942_v27  ;;  %v679_v27 = vcvt.s32.f32 %v677_v18 }
 0x221   : > { %1312 = vmatprep.subr.bf16.mxu1 %v1311_v17 }
 0x222   : > { %v663_v17 = vcvt.s32.f32 %v661_v16 }
 0x224   : > { %1314 = vmatpush3.bf16.msra.mxu1 %v1313_v24 }
 0x225   : > { %1316 = vmatprep.subr.bf16.mxu1 %v1315_v26 }
 0x228   : > { %1318 = vmatpush3.bf16.msra.mxu1 %v1317_v35  ;;  %v1570_v35 = vmov 1.0  }
 0x229   : > { %1320 = vmatprep.subr.bf16.mxu1 %v1319_v36 }
 0x22c   : > { %1322 = vmatpush3.bf16.msra.mxu1 %v1321_v39 }
 0x289   : > { %v570_v43 = vpop.xlane.xlu0 %569 }
 0x28a   : > { %vm571_vm8 = vcmp.eq.f32.partialorder %v1892_v59, %v570_v43 }
 0x28b   : > { %v572_v47 = vsel %vm571_vm8, %v567_v44, inf }
 0x28c   : > { %573 = vmin.xlane.f32.xlu0 %v572_v47 }
 0x28d   : > { %v1962_v48 = vpop.xlane.xlu1 %585 }
 0x28e   : > { %vm587_vm9 = vcmp.eq.f32.partialorder %v1900_v2, %v1962_v48  ;;  %v592_v26 = vcvt.f32.s32 %v1962_v48 }
 0x28f   : > { %v588_v62 = vsel %vm587_vm9, %v583_v57, inf }
 0x290   : > { %589 = vmin.xlane.f32.xlu1 %v588_v62  ;;  %v593_v30 = vshll.u32 %v592_v26, 16 }
 0x291   : > { %v1967_v63 = vpop.xlane.xlu0 %601 }
 0x292   : > { %vm603_vm10 = vcmp.eq.f32.partialorder %v1910_v7, %v1967_v63  ;;  %v1323_v7 = vpack.c.bf16 %v770_v8, %v769_v6  ;;  %v608_v28 = vcvt.f32.s32 %v1967_v63 }
 0x293   : > { %v604_v59 = vsel %vm603_vm10, %v599_v46, inf }
 0x294   : > { %605 = vmin.xlane.f32.xlu0 %v604_v59  ;;  %1324 = vmatprep.subr.bf16.mxu1 %v1323_v7  ;;  %v609_v37 = vshll.u32 %v608_v28, 16 }
 0x295   : > { %v1972_v61 = vpop.xlane.xlu1 %617  ;;  %1326 = vmatpush3.bf16.msra.mxu1 %v1325_v15 }
 0x296   : > { %vm619_vm11 = vcmp.eq.f32.partialorder %v1920_v13, %v1972_v61  ;;  %v624_v39 = vcvt.f32.s32 %v1972_v61 }
 0x297   : > { %v620_v2 = vsel %vm619_vm11, %v615_v0, inf }
 0x298   : > { %621 = vmin.xlane.f32.xlu1 %v620_v2  ;;  %v625_v47 = vshll.u32 %v624_v39, 16 }
 0x299   : > { %v1977_v4 = vpop.xlane.xlu0 %633 }
 0x29a   : > { %vm635_vm12 = vcmp.eq.f32.partialorder %v1930_v19, %v1977_v4  ;;  %v640_v44 = vcvt.f32.s32 %v1977_v4 }
 0x29b   : > { %v636_v12 = vsel %vm635_vm12, %v631_v5, inf }
 0x29c   : > { %637 = vmin.xlane.f32.xlu0 %v636_v12  ;;  %v641_v60 = vshll.u32 %v640_v44, 16 }
 0x29d   : > { %v1982_v13 = vpop.xlane.xlu1 %649 }
 0x29e   : > { %vm651_vm13 = vcmp.eq.f32.partialorder %v1940_v25, %v1982_v13  ;;  %v576_v25 = vcvt.f32.s32 %v570_v43  ;;  %v656_v63 = vcvt.f32.s32 %v1982_v13 }
 0x29f   : > { %v652_v21 = vsel %vm651_vm13, %v647_v14, inf }
 0x2a0   : > { %653 = vmin.xlane.f32.xlu1 %v652_v21  ;;  %v577_v32 = vshll.u32 %v576_v25, 16  ;;  %v657_v0 = vshll.u32 %v656_v63, 16  ;;  %v930_v63 = vadd.s32 24, %v1843_v58 }
 0x2a1   : > { %v1987_v19 = vpop.xlane.xlu0 %665 }
 0x2a2   : > { %vm667_vm14 = vcmp.eq.f32.partialorder %v1950_v31, %v1987_v19  ;;  %v672_v59 = vcvt.f32.s32 %v1987_v19 }
 0x2a3   : > { %v668_v20 = vsel %vm667_vm14, %v663_v17, inf }
 0x2a4   : > { %669 = vmin.xlane.f32.xlu0 %v668_v20  ;;  %v673_v4 = vshll.u32 %v672_v59, 16  ;;  %v931_v59 = vadd.s32 32, %v1843_v58 }
 0x2a5   : > { %v1992_v22 = vpop.xlane.xlu1 %681 }
 0x2a6   : > { %vm683_vm15 = vcmp.eq.f32.partialorder %v1956_v34, %v1992_v22  ;;  %v688_v9 = vcvt.f32.s32 %v1992_v22 }
 0x2a7   : > { %v684_v23 = vsel %vm683_vm15, %v679_v27, inf }
 0x2a8   : > { %685 = vmin.xlane.f32.xlu1 %v684_v23  ;;  %v689_v10 = vshll.u32 %v688_v9, 16 }
 0x319   : > { %v574_v24 = vpop.xlane.xlu0 %573 }
 0x31a   : > { %v575_v31 = vcvt.f32.s32 %v574_v24 }
 0x31c   : > { %v578_v34 = vadd.s32 %v577_v32, %v575_v31 }
 0x31d   : > { %v590_v29 = vpop.xlane.xlu1 %589 }
 0x31e   : > { %885 = vst.msk [vmem:[%s2001_s30] sm:$0xff] %vm884_vm0, %v578_v34  ;;  %v591_v33 = vcvt.f32.s32 %v590_v29  ;;  %vm692_vm1 = vcmp.eq.s32.totalorder %v1883_v41, %v578_v34  ;;  %vm691_vm2 = vcmp.eq.s32.totalorder %v1880_v40, %v578_v34 }
 0x31f   : > { %1183 = vmatprep.mubr.msk.f32.mxu1 %vm692_vm1, %v1570_v35 }
 0x320   : > { %v594_v36 = vadd.s32 %v593_v30, %v591_v33  ;;  %1184 = vmatmul.mubr.msk.f32.vlgmr.msra.gmra.mrb[0].mxu1 %vm691_vm2, %v1570_v35 }
 0x321   : > { %v606_v38 = vpop.xlane.xlu0 %605 }
 0x322   : > { %886 = vst.msk [vmem:[%s2001_s30 + $0x8] sm:$0xff] %vm884_vm0, %v594_v36  ;;  %v607_v42 = vcvt.f32.s32 %v606_v38  ;;  %vm694_vm3 = vcmp.eq.s32.totalorder %v1883_v41, %v594_v36  ;;  %vm693_vm4 = vcmp.eq.s32.totalorder %v1880_v40, %v594_v36 }
 0x323   : > { %1185 = vmatprep.mubr.msk.f32.mxu1 %vm694_vm3, %v1570_v35 }
 0x324   : > { %v610_v43 = vadd.s32 %v609_v37, %v607_v42  ;;  %1186 = vmatmul.mubr.msk.f32.gmra.mrb[2].mxu1 %vm693_vm4, %v1570_v35 }
 0x325   : > { %v622_v45 = vpop.xlane.xlu1 %621 }
 0x326   : > { %887 = vst.msk [vmem:[%s2001_s30 + $0x10] sm:$0xff] %vm884_vm0, %v610_v43  ;;  %v623_v48 = vcvt.f32.s32 %v622_v45  ;;  %vm696_vm5 = vcmp.eq.s32.totalorder %v1883_v41, %v610_v43  ;;  %vm695_vm6 = vcmp.eq.s32.totalorder %v1880_v40, %v610_v43 }
 0x327   : > { %1187 = vmatprep.mubr.msk.f32.mxu1 %vm696_vm5, %v1570_v35 }
 0x328   : > { %v626_v57 = vadd.s32 %v625_v47, %v623_v48  ;;  %1188 = vmatmul.mubr.msk.f32.gmra.mrb[4].mxu1 %vm695_vm6, %v1570_v35 }
 0x329   : > { %v638_v62 = vpop.xlane.xlu0 %637 }
 0x32a   : > { %888 = vst.msk [vmem:[%s2001_s30 + $0x18] sm:$0xff] %vm884_vm0, %v626_v57  ;;  %v639_v46 = vcvt.f32.s32 %v638_v62  ;;  %vm698_vm7 = vcmp.eq.s32.totalorder %v1883_v41, %v626_v57  ;;  %vm697_vm8 = vcmp.eq.s32.totalorder %v1880_v40, %v626_v57  ;;  %v929_v57 = vadd.s32 16, %v1843_v58 }
 0x32b   : > { %1189 = vmatprep.mubr.msk.f32.mxu1 %vm698_vm7, %v1570_v35 }
 0x32c   : > { %v642_v1 = vadd.s32 %v641_v60, %v639_v46  ;;  %1190 = vmatmul.mubr.msk.f32.gmra.mrb[6].mxu1 %vm697_vm8, %v1570_v35  ;;  %v935_v60 = vstv %s1199_s13 }
 0x32d   : > { %v654_v61 = vpop.xlane.xlu1 %653 }
 0x32e   : > { %889 = vst.msk [vmem:[%s2001_s30 + $0x20] sm:$0xff] %vm884_vm0, %v642_v1  ;;  %v655_v3 = vcvt.f32.s32 %v654_v61  ;;  %vm700_vm9 = vcmp.eq.s32.totalorder %v1883_v41, %v642_v1  ;;  %vm699_vm10 = vcmp.eq.s32.totalorder %v1880_v40, %v642_v1  ;;  %v938_v1 = vadd.s32 %v935_v60, %v929_v57 }
 0x32f   : > { %1191 = vmatprep.mubr.msk.f32.mxu1 %vm700_vm9, %v1570_v35  ;;  %v932_v61 = vadd.s32 40, %v1843_v58 }
 0x330   : > { %v658_v2 = vadd.s32 %v657_v0, %v655_v3  ;;  %1192 = vmatmul.mubr.msk.f32.gmra.mrb[8].mxu1 %vm699_vm10, %v1570_v35  ;;  %v939_v0 = vadd.s32 %v935_v60, %v930_v63  ;;  %vm946_vm4 = vcmp.lt.s32.totalorder %v938_v1, 96 }
 0x331   : > { %v670_v5 = vpop.xlane.xlu0 %669 }
 0x332   : > { %890 = vst.msk [vmem:[%s2001_s30 + $0x28] sm:$0xff] %vm884_vm0, %v658_v2  ;;  %v671_v6 = vcvt.f32.s32 %v670_v5  ;;  %vm702_vm11 = vcmp.eq.s32.totalorder %v1883_v41, %v658_v2  ;;  %vm701_vm12 = vcmp.eq.s32.totalorder %v1880_v40, %v658_v2  ;;  %v940_v2 = vadd.s32 %v935_v60, %v931_v59 }
 0x333   : > { %1193 = vmatprep.mubr.msk.f32.mxu1 %vm702_vm11, %v1570_v35  ;;  %v941_v5 = vadd.s32 %v935_v60, %v932_v61  ;;  %vm947_vm5 = vcmp.lt.s32.totalorder %v939_v0, 96 }
 0x334   : > { %v674_v8 = vadd.s32 %v673_v4, %v671_v6  ;;  %1194 = vmatmul.mubr.msk.f32.gmra.mrb[10].mxu1 %vm701_vm12, %v1570_v35  ;;  %v933_v6 = vadd.s32 48, %v1843_v58  ;;  %vm948_vm6 = vcmp.lt.s32.totalorder %v940_v2, 96 }
 0x335   : > { %v686_v7 = vpop.xlane.xlu1 %685  ;;  %vm949_vm7 = vcmp.lt.s32.totalorder %v941_v5, 96 }
 0x336   : > { %891 = vst.msk [vmem:[%s2001_s30 + $0x30] sm:$0xff] %vm884_vm0, %v674_v8  ;;  %v687_v11 = vcvt.f32.s32 %v686_v7  ;;  %vm704_vm13 = vcmp.eq.s32.totalorder %v1883_v41, %v674_v8  ;;  %vm703_vm14 = vcmp.eq.s32.totalorder %v1880_v40, %v674_v8 }
 0x337   : > { %1195 = vmatprep.mubr.msk.f32.mxu1 %vm704_vm13, %v1570_v35 }
 0x338   : > { %v690_v12 = vadd.s32 %v689_v10, %v687_v11  ;;  %1196 = vmatmul.mubr.msk.f32.gmra.mrb[12].mxu1 %vm703_vm14, %v1570_v35 }
 0x33a   : > { %892 = vst.msk [vmem:[%s2001_s30 + $0x38] sm:$0xff] %vm884_vm0, %v690_v12  ;;  %vm706_vm15 = vcmp.eq.s32.totalorder %v1883_v41, %v690_v12  ;;  %vm705_vm1 = vcmp.eq.s32.totalorder %v1880_v40, %v690_v12 }
 0x33b   : > { %1197 = vmatprep.mubr.msk.f32.mxu1 %vm706_vm15, %v1570_v35 }
 0x33c   : > { %1198 = vmatmul.mubr.msk.f32.gmra.mrb[14].mxu1 %vm705_vm1, %v1570_v35 }
 0x3f3   : > { %v1239_v15 = vpop.f32.mrb[0].mxu1 }
 0x3f4   : > { %v1240_v13 = vpop.f32.mrb[1].mxu1 }
 0x3f5   : > { %v1241_v14 = vadd.f32 %v1240_v13, %v1239_v15 }
 0x3f7   : > { %876 = vst [vmem:[%s2059_s12] sm:$0xff] %v1241_v14  ;;  %v1242_v16 = vpop.f32.mrb[2].mxu1  ;;  %v893_v21 = vsub.f32 %v1241_v14, %v1805_v49  ;;  %v942_v14 = vadd.s32 %v935_v60, %v933_v6 }
 0x3f8   : > { %v1243_v41 = vpop.f32.mrb[3].mxu1 }
 0x3f9   : > { %v1244_v19 = vadd.f32 %v1243_v41, %v1242_v16  ;;  %v901_v40 = vmul.f32 %v893_v21, %v893_v21  ;;  %v934_v16 = vadd.s32 56, %v1843_v58  ;;  %vm950_vm8 = vcmp.lt.s32.totalorder %v942_v14, 96 }
 0x3fb   : > { %877 = vst [vmem:[%s2059_s12 + $0x8] sm:$0xff] %v1244_v19  ;;  %909 = vadd.xlane.f32.xlu0 %v901_v40  ;;  %v1245_v17 = vpop.f32.mrb[4].mxu1  ;;  %v894_v18 = vsub.f32 %v1244_v19, %v1810_v50 }
 0x3fc   : > { %v1246_v20 = vpop.f32.mrb[5].mxu1 }
 0x3fd   : > { %v1247_v22 = vadd.f32 %v1246_v20, %v1245_v17  ;;  %v902_v27 = vmul.f32 %v894_v18, %v894_v18 }
 0x3ff   : > { %878 = vst [vmem:[%s2059_s12 + $0x10] sm:$0xff] %v1247_v22  ;;  %911 = vadd.xlane.f32.xlu1 %v902_v27  ;;  %v1248_v23 = vpop.f32.mrb[6].mxu1  ;;  %v895_v25 = vsub.f32 %v1247_v22, %v1815_v51  ;;  %v943_v22 = vadd.s32 %v935_v60, %v934_v16 }
 0x400   : > { %v1249_v24 = vpop.f32.mrb[7].mxu1 }
 0x401   : > { %v1250_v49 = vadd.f32 %v1249_v24, %v1248_v23  ;;  %v903_v32 = vmul.f32 %v895_v25, %v895_v25  ;;  %vm951_vm9 = vcmp.lt.s32.totalorder %v943_v22, 96 }
 0x403   : > { %879 = vst [vmem:[%s2059_s12 + $0x18] sm:$0xff] %v1250_v49  ;;  %913 = vadd.xlane.f32.xlu0 %v903_v32  ;;  %v1251_v26 = vpop.f32.mrb[8].mxu1  ;;  %v896_v31 = vsub.f32 %v1250_v49, %v1820_v52 }
 0x404   : > { %v1252_v34 = vpop.f32.mrb[9].mxu1 }
 0x405   : > { %v1253_v50 = vadd.f32 %v1252_v34, %v1251_v26  ;;  %v904_v28 = vmul.f32 %v896_v31, %v896_v31 }
 0x407   : > { %880 = vst [vmem:[%s2059_s12 + $0x20] sm:$0xff] %v1253_v50  ;;  %915 = vadd.xlane.f32.xlu1 %v904_v28  ;;  %v1254_v29 = vpop.f32.mrb[10].mxu1  ;;  %v897_v30 = vsub.f32 %v1253_v50, %v1825_v53 }
 0x408   : > { %v1255_v33 = vpop.f32.mrb[11].mxu1 }
 0x409   : > { %v1256_v51 = vadd.f32 %v1255_v33, %v1254_v29  ;;  %v905_v35 = vmul.f32 %v897_v30, %v897_v30 }
 0x40b   : > { %881 = vst [vmem:[%s2059_s12 + $0x28] sm:$0xff] %v1256_v51  ;;  %917 = vadd.xlane.f32.xlu0 %v905_v35  ;;  %v1257_v36 = vpop.f32.mrb[12].mxu1  ;;  %v898_v37 = vsub.f32 %v1256_v51, %v1830_v54  ;;  %v928_v54 = vadd.s32 8, %v1843_v58 }
 0x40c   : > { %v1258_v52 = vpop.f32.mrb[13].mxu1 }
 0x40d   : > { %v1259_v38 = vadd.f32 %v1258_v52, %v1257_v36  ;;  %v906_v39 = vmul.f32 %v898_v37, %v898_v37  ;;  %v937_v62 = vadd.s32 %v935_v60, %v928_v54 }
 0x40f   : > { %882 = vst [vmem:[%s2059_s12 + $0x30] sm:$0xff] %v1259_v38  ;;  %919 = vadd.xlane.f32.xlu1 %v906_v39  ;;  %v1260_v42 = vpop.f32.mrb[14].mxu1  ;;  %v899_v43 = vsub.f32 %v1259_v38, %v1835_v55  ;;  %v936_v55 = vadd.s32 %v935_v60, %v1843_v58  ;;  %vm945_vm2 = vcmp.lt.s32.totalorder %v937_v62, 96 }
 0x410   : > { %v1261_v44 = vpop.f32.mrb[15].mxu1 }
 0x411   : > { %v1262_v53 = vadd.f32 %v1261_v44, %v1260_v42  ;;  %v907_v45 = vmul.f32 %v899_v43, %v899_v43  ;;  %vm944_vm3 = vcmp.lt.s32.totalorder %v936_v55, 96 }
 0x413   : > { %883 = vst [vmem:[%s2059_s12 + $0x38] sm:$0xff] %v1262_v53  ;;  %921 = vadd.xlane.f32.xlu0 %v907_v45  ;;  %v900_v47 = vsub.f32 %v1262_v53, %v1840_v56 }
 0x415   : > { %v908_v48 = vmul.f32 %v900_v47, %v900_v47 }
 0x417   : > { %923 = vadd.xlane.f32.xlu1 %v908_v48 }
 0x488   : > { %v910_v46 = vpop.xlane.xlu0 %909 }
 0x489   : > { %v952_v8 = vsel %vm944_vm3, %v910_v46, 0.0 }
 0x48a   : > { %v960_v15 = vsel %vm884_vm0, %v952_v8, 0.0 }
 0x48c   : > { %v912_v56 = vpop.xlane.xlu1 %911 }
 0x48d   : > { %v953_v4 = vsel %vm945_vm2, %v912_v56, 0.0 }
 0x48e   : > { %v961_v10 = vsel %vm884_vm0, %v953_v4, 0.0 }
 0x48f   : > { %v962_v21 = vadd.f32 %v961_v10, %v960_v15 }
 0x490   : > { %v914_v3 = vpop.xlane.xlu0 %913 }
 0x491   : > { %v954_v7 = vsel %vm946_vm4, %v914_v3, 0.0 }
 0x492   : > { %v963_v13 = vsel %vm884_vm0, %v954_v7, 0.0 }
 0x493   : > { %v964_v17 = vadd.f32 %v963_v13, %v962_v21 }
 0x494   : > { %v916_v9 = vpop.xlane.xlu1 %915 }
 0x495   : > { %v955_v12 = vsel %vm947_vm5, %v916_v9, 0.0 }
 0x496   : > { %v965_v19 = vsel %vm884_vm0, %v955_v12, 0.0 }
 0x497   : > { %v966_v27 = vadd.f32 %v965_v19, %v964_v17 }
 0x498   : > { %v918_v11 = vpop.xlane.xlu0 %917 }
 0x499   : > { %v956_v41 = vsel %vm948_vm6, %v918_v11, 0.0 }
 0x49a   : > { %v967_v20 = vsel %vm884_vm0, %v956_v41, 0.0 }
 0x49b   : > { %v968_v24 = vadd.f32 %v967_v20, %v966_v27 }
 0x49c   : > { %v920_v40 = vpop.xlane.xlu1 %919 }
 0x49d   : > { %v957_v18 = vsel %vm949_vm7, %v920_v40, 0.0 }
 0x49e   : > { %v969_v23 = vsel %vm884_vm0, %v957_v18, 0.0 }
 0x49f   : > { %v970_v32 = vadd.f32 %v969_v23, %v968_v24 }
 0x4a0   : > { %v922_v25 = vpop.xlane.xlu0 %921 }
 0x4a1   : > { %v958_v58 = vsel %vm950_vm8, %v922_v25, 0.0 }
 0x4a2   : > { %v971_v49 = vsel %vm884_vm0, %v958_v58, 0.0 }
 0x4a3   : > { %v972_v31 = vadd.f32 %v971_v49, %v970_v32 }
 0x4a4   : > { %v924_v26 = vpop.xlane.xlu1 %923 }
 0x4a5   : > { %v959_v34 = vsel %vm951_vm9, %v924_v26, 0.0 }
 0x4a6   : > { %v973_v50 = vsel %vm884_vm0, %v959_v34, 0.0 }
 0x4a7   : > { %v974_v28 = vadd.f32 %v973_v50, %v972_v31 }
 0x4a9   : > { %975 = vadd.xlane.f32.xlu0 %v974_v28 }
 0x4aa   : > { %1503 = shalt.err (!%p1500_p13)
}
 0x4ab   : > { %s1504_s19 = scalar_lea.hbm %s2101_s20, 1024  ;;  %s1508_s13 = scalar_lea.hbm %s2154_s4, 2048 }
 0x4ac   : > { %p1505_p6 = scmp.ne.s32.totalorder %s2101_s20, %s1504_s19  ;;  %p1509_p7 = scmp.lt.u32.totalorder %s2101_s20, %s2154_s4 }
 0x4ad   : > { %p1510_p8 = scmp.lt.u32.totalorder %s1508_s13, %s1504_s19  ;;  %p1512_p0 = scmp.lt.u32.totalorder %s1504_s19, %s2101_s20 }
 0x4ae   : > { %p1506_p10 = pnand %p1505_p6, %p2170_p1 }
 0x4af   : > { %p1511_p11 = por %p1510_p8, %p1509_p7 }
 0x4b0   : > { %p1507_p4 = pneg %p1506_p10 }
 0x4b1   : > { %p1513_p3 = por %p1512_p0, %p1511_p11 }
 0x4b3   : > { %p1514_p5 = pnand %p1513_p3, %p1507_p4 }
 0x4b5   : > { %1517 = shalt.err (!%p1514_p5)
}
 0x4b6   : > { %s1572_s7 = smov 128   ;;  %s1573_s29 = smov 8   ;;  %vm985_vm0 = vcmask 0  }
 0x4b7   : > { %1339 = dma.vmem_to_hbm [thread:$0]  (%p2170_p1), %s2095_s10, 1024, %s2101_s20, %s988_s27, %s1572_s7, %s1572_s7, %s1573_s29  }
 0x4b8   : > { %p320_p9 = scmp.lt.s32.totalorder %s1630_s25, 1 }
 0x4ba   : > { %s2180_s25 = smov (!%p320_p9, %s1630_s25), 1 }
 0x4bb   : > { %s322_s16 = scalar_lea.vmem %s2156_s6, %s2180_s25 }
 0x536   : > { %v976_v29 = vpop.xlane.xlu0 %975 }
 0x537   : > { %v977_v30 = vrot.slane %v976_v29, 4 }
 0x539   : > { %v978_v33 = vadd.f32 %v977_v30, %v976_v29 }
 0x53b   : > { %v979_v51 = vrot.slane %v978_v33, 2 }
 0x53d   : > { %v980_v35 = vadd.f32 %v979_v51, %v978_v33 }
 0x53f   : > { %v981_v36 = vrot.slane %v980_v35, 1 }
 0x541   : > { %v982_v37 = vadd.f32 %v981_v36, %v980_v35 }
 0x543   : > { %1327 = vpush %v982_v37 }
 0x574   : > { %s1328_s19 = spop %1327 }
 0x575   : > { %v984_v52 = vstv %s1328_s19 }
 0x576   : > { %986 = vst.msk [vmem:[%s322_s16] sm:$0x1] %vm985_vm0, %v984_v52 }
 0x577 PF: > { %s1031_s8 = sand.u32 1, %s1548_s21   ;;  %p2171_p1 = scmp.ne.s32.totalorder %s2161_s28, 0 }
 0x578   : > { %p2172_p12 = scmp.ge.s32.totalorder %s1560_s24, 2  ;;  %s1032_s9 = scalar_lea.sflag [#allocation4], %s1031_s8 }
 0x57a   : > { %p1353_p2 = pnand %p2172_p12, %p2171_p1 }
 0x57c   : > { %1543 = dma.done.wait (!%p1353_p2), %s1032_s9, 1024  }
 0x57d   : > { %1545 = vsyncadd (!%p1353_p2), %s1032_s9, 4294966272  ;;  %p21_p13 = scmp.ge.s32.totalorder %s1722_s26, 4   ;;  %s2173_s21 = smov %s1552_s22 }
 0x57e   : > { %s2174_s22 = smov %s1556_s23  ;;  %s2175_s23 = smov %s1731_s11 }
 0x57f   : > { %s2176_s24 = smov %s1722_s26  ;;  %23 = sbr.rel (!%p21_p13) target bundleno = 6 (0x6), region = 113 }
 0x586   :  { %1051 = vsyncpa [#allocation3], 1 }
 0x587   :  { %1053 = vsyncpa [#allocation3 + $0x1], 1 }
 0x588   :  { %1054 = vsyncpa [#allocation6], 1 }
 0x589   :  { %1055 = vsyncpa [#allocation4], 1 }
 0x58a   :  { %1057 = vsyncpa [#allocation4 + $0x1], 1 }

</bundles_post_ra>
